<compile_context>
chip_gen: v7x
topology: tpu7x:2x2x1
jax: 0.10.0
libtpu: 0.0.40
codegen_flags: <defaults>
</compile_context>

<pallas_src>
import functools

import jax
import jax.numpy as jnp
import numpy as np
from jax import lax
from jax.experimental import pallas as pl
from jax.experimental.pallas import tpu as pltpu


def _round_up(x, m):
    return ((x + m - 1) // m) * m


def _nbytes(dt):
    return jnp.dtype(dt).itemsize


# ---------------------------------------------------------------------------
# Kernel 1: time-parallel input projection   gx = x @ W_ih_f + b_fused
# ---------------------------------------------------------------------------
def _input_proj_kernel(x_ref, w_ref, b_ref, o_ref, *, matmul_dtype):
    x = x_ref[...].astype(matmul_dtype)                       # (TM, I)
    acc = jnp.dot(x, w_ref[...],                              # W pre-cast
                  preferred_element_type=jnp.float32)         # (TM, 3Hp) f32
    o_ref[...] = (acc + b_ref[...]).astype(o_ref.dtype)


# ---------------------------------------------------------------------------
# Kernel 2: sequential GRU recurrence, t_blk timesteps per grid step,
#           batch blocked for megacore sharding.
# ---------------------------------------------------------------------------
def _gru_scan_kernel(gx_ref, keep_ref, carry_ref, whh_ref, bhn_ref,
                     y_ref, h_scratch, *, t_blk, hidden_pad, matmul_dtype):
    # Initialize the carried hidden state on the first time block of each
    # batch block (each core / batch block owns its own scratch slice).
    @pl.when(pl.program_id(1) == 0)
    def _():
        h_scratch[...] = carry_ref[...]

    w_hh = whh_ref[...]            # (Hp, 3Hp), already in matmul_dtype
    b_hn = bhn_ref[...]            # (1, Hp) f32
    Hp = hidden_pad

    def step(i, h):
        # Reset: h <- 0 where reset (multiply, not compare+select).
        h = h * keep_ref[i]                                        # (B,Hp)*(B,1)
        # Single fused hidden matmul; gates stacked [r | z | n] on lanes,
        # each gate 128-lane aligned.
        gh = jnp.dot(h.astype(matmul_dtype), w_hh,
                     preferred_element_type=jnp.float32)           # (B, 3Hp)
        gx = gx_ref[i].astype(jnp.float32)                         # (B, 3Hp)
        r = jax.nn.sigmoid(gx[:, :Hp] + gh[:, :Hp])
        z = jax.nn.sigmoid(gx[:, Hp:2 * Hp] + gh[:, Hp:2 * Hp])
        n = jnp.tanh(gx[:, 2 * Hp:] + r * (gh[:, 2 * Hp:] + b_hn))
        h = (1.0 - z) * n + z * h
        y_ref[i] = h.astype(y_ref.dtype)
        return h

    # fori_loop(unroll=True) keeps scheduler visibility with bounded live ranges.
    h = lax.fori_loop(0, t_blk, step, h_scratch[...], unroll=True)
    h_scratch[...] = h


# ---------------------------------------------------------------------------
# Parameter prep (hoisted out of the per-call path; lane-padded, pre-cast)
# ---------------------------------------------------------------------------
def prepare_gru_params(w_ih, w_hh, b_ih, b_hh, *, matmul_dtype=jnp.float32,
                       lane=128):
    """w_ih: (3H, I), w_hh: (3H, H), b_ih/b_hh: (3H,) (torch GRUCell layout,
    gates stacked r, z, n).  Returns lane-padded, fused, pre-cast params."""
    three_h = w_ih.shape[0]
    H = three_h // 3
    Hp = _round_up(H, lane)
    padH = Hp - H

    w_ih = jnp.asarray(w_ih, jnp.float32)
    w_hh = jnp.asarray(w_hh, jnp.float32)
    b_ih = jnp.asarray(b_ih, jnp.float32)
    b_hh = jnp.asarray(b_hh, jnp.float32)

    # (I, 3Hp): each gate padded to Hp lanes so slices are 128-aligned.
    w_ih_f = jnp.concatenate(
        [jnp.pad(w_ih[g * H:(g + 1) * H].T, ((0, 0), (0, padH)))
         for g in range(3)], axis=1).astype(matmul_dtype)
    # (Hp, 3Hp): padded input-hidden rows are zero -> padded lanes never
    # contaminate real lanes.
    w_hh_f = jnp.concatenate(
        [jnp.pad(w_hh[g * H:(g + 1) * H].T, ((0, padH), (0, padH)))
         for g in range(3)], axis=1).astype(matmul_dtype)

    # Fold b_hh for the r and z gates into the time-parallel input bias.
    b_x = jnp.concatenate([
        jnp.pad(b_ih[:H] + b_hh[:H], (0, padH)),
        jnp.pad(b_ih[H:2 * H] + b_hh[H:2 * H], (0, padH)),
        jnp.pad(b_ih[2 * H:], (0, padH))])                      # (3Hp,)
    b_hn = jnp.pad(b_hh[2 * H:], (0, padH))                      # (Hp,)
    return w_ih_f, w_hh_f, b_x.reshape(1, 3 * Hp), b_hn.reshape(1, Hp), Hp


# ---------------------------------------------------------------------------
# Time-parallel input projection over all (S*B) rows
# ---------------------------------------------------------------------------
def _input_projection(x2d, w_ih_f, b_x, gx_dtype, matmul_dtype):
    # TODO(synk): for very large I / 3H, tile K (reduction) and N with an f32
    # accumulator scratch instead of full-K / full-N blocks.
    M, I = x2d.shape
    G = w_ih_f.shape[1]
    TM = M if M <= 512 else 512                   # M is a multiple of 8
    M_pad = _round_up(M, TM)
    if M_pad != M:
        x2d = jnp.pad(x2d, ((0, M_pad - M), (0, 0)))

    vmem = (2 * (TM * I * 4 + I * G * _nbytes(matmul_dtype) + G * 4
                 + TM * G * _nbytes(gx_dtype)) + (4 << 20))
    vmem = int(min(64 << 20, max(16 << 20, vmem)))

    gx = pl.pallas_call(
        functools.partial(_input_proj_kernel, matmul_dtype=matmul_dtype),
        out_shape=jax.ShapeDtypeStruct((M_pad, G), gx_dtype),
        grid_spec=pltpu.PrefetchScalarGridSpec(
            num_scalar_prefetch=0,
            grid=(M_pad // TM,),
            in_specs=[
                pl.BlockSpec((TM, I), lambda m: (m, 0)),   # x rows
                pl.BlockSpec((I, G), lambda m: (0, 0)),    # W_ih fused (resident)
                pl.BlockSpec((1, G), lambda m: (0, 0)),    # fused bias
            ],
            out_specs=pl.BlockSpec((TM, G), lambda m: (m, 0)),
        ),
        compiler_params=pltpu.CompilerParams(
            dimension_semantics=("parallel",),
            vmem_limit_bytes=vmem),
    )(x2d, w_ih_f, b_x)
    return gx[:M]


# ---------------------------------------------------------------------------
# Public entry point
# ---------------------------------------------------------------------------
def scanned_rnn_pallas(carry, seq_inputs, seq_resets, w_ih, w_hh, b_ih, b_hh,
                       *, matmul_dtype=jnp.float32, time_block=16,
                       batch_block=None):
    """carry: (B,H); seq_inputs: (S,B,I); seq_resets: (S,B);
    w_ih: (3H,I), w_hh: (3H,H), b_ih/b_hh: (3H,) (PyTorch GRUCell shapes).
    Pass matmul_dtype=jnp.bfloat16 for production (gate math stays f32)."""
    S, B, I = seq_inputs.shape
    H = carry.shape[1]

    w_ih_f, w_hh_f, b_x, b_hn, Hp = prepare_gru_params(
        w_ih, w_hh, b_ih, b_hh, matmul_dtype=matmul_dtype)
    G = 3 * Hp
    gx_dtype = jnp.float32 if matmul_dtype == jnp.float32 else jnp.bfloat16
    gx_b, w_b = _nbytes(gx_dtype), _nbytes(matmul_dtype)

    # ---- batch padding (sublanes) + batch block (v7x megacore sharding) ----
    B_pad = _round_up(B, 8)
    if batch_block is None:
        batch_block = B_pad // 2 if (B_pad % 16 == 0) else B_pad
    B_BLK = batch_block
    if B_BLK <= 0 or B_BLK % 8 != 0 or B_pad % B_BLK != 0:
        B_BLK = B_pad

    # ---- time block chosen against an explicit streaming-VMEM budget -------
    t_blk = max(1, min(time_block, S))

    def _stream_bytes(t):   # double-buffered gx + keep + out blocks
        return 2 * (t * B_BLK * G * gx_b + t * B_BLK * 4 + t * B_BLK * Hp * 4)

    while t_blk > 1 and _stream_bytes(t_blk) > (12 << 20):
        t_blk = max(1, t_blk // 2)
    S_pad = _round_up(S, t_blk)          # padded last block, computed & discarded

    # ---- pad operands -------------------------------------------------------
    x = jnp.asarray(seq_inputs, jnp.float32)
    x = jnp.pad(x, ((0, S_pad - S), (0, B_pad - B), (0, 0)))
    keep = 1.0 - (jnp.asarray(seq_resets) > 0.5).astype(jnp.float32)
    keep = jnp.pad(keep, ((0, S_pad - S), (0, B_pad - B))
                   ).reshape(S_pad, B_pad, 1)
    carry_p = jnp.pad(jnp.asarray(carry, jnp.float32),
                      ((0, B_pad - B), (0, Hp - H)))

    # ---- (1) time-parallel half of the GRU (input projection) ---------------
    gx = _input_projection(x.reshape(S_pad * B_pad, I), w_ih_f, b_x,
                           gx_dtype, matmul_dtype)
    gx = gx.reshape(S_pad, B_pad, G)

    # ---- (2) sequential recurrence ------------------------------------------
    rec_vmem = (_stream_bytes(t_blk)
                + 2 * (B_BLK * Hp * 4 + Hp * G * w_b + Hp * 4)
                + B_BLK * Hp * 4 + (4 << 20))
    rec_vmem = int(min(64 << 20, max(16 << 20, rec_vmem)))

    kernel = functools.partial(_gru_scan_kernel, t_blk=t_blk, hidden_pad=Hp,
                               matmul_dtype=matmul_dtype)

    outputs_p = pl.pallas_call(
        kernel,
        out_shape=jax.ShapeDtypeStruct((S_pad, B_pad, Hp), jnp.float32),
        grid_spec=pltpu.PrefetchScalarGridSpec(
            num_scalar_prefetch=0,
            grid=(B_pad // B_BLK, S_pad // t_blk),   # (batch parallel, time serial)
            in_specs=[
                pl.BlockSpec((t_blk, B_BLK, G), lambda b, t: (t, b, 0)),   # gx
                pl.BlockSpec((t_blk, B_BLK, 1), lambda b, t: (t, b, 0)),   # keep
                pl.BlockSpec((B_BLK, Hp), lambda b, t: (b, 0)),            # carry0
                pl.BlockSpec((Hp, G), lambda b, t: (0, 0)),                # W_hh
                pl.BlockSpec((1, Hp), lambda b, t: (0, 0)),                # b_hn
            ],
            out_specs=pl.BlockSpec((t_blk, B_BLK, Hp), lambda b, t: (t, b, 0)),
            scratch_shapes=[pltpu.VMEM((B_BLK, Hp), jnp.float32)],         # carried h
        ),
        compiler_params=pltpu.CompilerParams(
            dimension_semantics=("parallel", "arbitrary"),
            vmem_limit_bytes=rec_vmem),
    )(gx, keep, carry_p, w_hh_f, b_hn)

    outputs = outputs_p[:S, :B, :H]
    # Final hidden state is the last per-step output (no separate output path).
    return outputs[-1], outputs


# ---------------------------------------------------------------------------
# Pure-JAX reference mirroring torch.nn.GRUCell semantics
# ---------------------------------------------------------------------------
def scanned_rnn_ref(carry, seq_inputs, seq_resets, w_ih, w_hh, b_ih, b_hh):
    H = carry.shape[1]
    W_ir, W_iz, W_in = w_ih[:H], w_ih[H:2 * H], w_ih[2 * H:]
    W_hr, W_hz, W_hn = w_hh[:H], w_hh[H:2 * H], w_hh[2 * H:]
    b_ir, b_iz, b_in = b_ih[:H], b_ih[H:2 * H], b_ih[2 * H:]
    b_hr, b_hz, b_hn = b_hh[:H], b_hh[H:2 * H], b_hh[2 * H:]

    h = carry
    outs = []
    for t in range(seq_inputs.shape[0]):
        x = seq_inputs[t]
        reset = seq_resets[t][:, None] > 0.5
        h = jnp.where(reset, jnp.zeros_like(h), h)
        r = jax.nn.sigmoid(x @ W_ir.T + b_ir + h @ W_hr.T + b_hr)
        z = jax.nn.sigmoid(x @ W_iz.T + b_iz + h @ W_hz.T + b_hz)
        n = jnp.tanh(x @ W_in.T + b_in + r * (h @ W_hn.T + b_hn))
        h = (1.0 - z) * n + z * h
        outs.append(h)
    return h, jnp.stack(outs, axis=0)


if __name__ == "__main__":
    S, B, I, H = 8, 8, 32, 32

    key = jax.random.PRNGKey(0)
    k_x, k_r, k_wih, k_whh, k_bih, k_bhh, k_c = jax.random.split(key, 7)

    seq_inputs = jax.random.normal(k_x, (S, B, I), dtype=jnp.float32)
    seq_resets = (jax.random.uniform(k_r, (S, B)) < 0.3).astype(jnp.float32)
    carry = jax.random.normal(k_c, (B, H), dtype=jnp.float32)

    bound = 1.0 / np.sqrt(H)
    w_ih = jax.random.uniform(k_wih, (3 * H, I), minval=-bound, maxval=bound)
    w_hh = jax.random.uniform(k_whh, (3 * H, H), minval=-bound, maxval=bound)
    b_ih = jax.random.uniform(k_bih, (3 * H,), minval=-bound, maxval=bound)
    b_hh = jax.random.uniform(k_bhh, (3 * H,), minval=-bound, maxval=bound)

    h_final, outputs = scanned_rnn_pallas(
        carry, seq_inputs, seq_resets, w_ih, w_hh, b_ih, b_hh)
    jax.block_until_ready((h_final, outputs))

    h_ref, out_ref = scanned_rnn_ref(
        carry, seq_inputs, seq_resets, w_ih, w_hh, b_ih, b_hh)

    np.testing.assert_allclose(np.asarray(h_final), np.asarray(h_ref),
                               rtol=1e-5, atol=1e-5)
    np.testing.assert_allclose(np.asarray(outputs), np.asarray(out_ref),
                               rtol=1e-5, atol=1e-5)
    print("KERNEL_OK")
</pallas_src>

<mosaic_0001>
module attributes {stable_mosaic.version = 11 : i64} {
  func.func @_input_proj_kernel(%arg0: i32, %arg1: memref<64x32xf32, #tpu.memory_space<vmem>>, %arg2: memref<32x384xf32, #tpu.memory_space<vmem>>, %arg3: memref<1x384xf32, #tpu.memory_space<vmem>>, %arg4: memref<64x384xf32, #tpu.memory_space<vmem>>) attributes {dimension_semantics = [#tpu.dimension_semantics<parallel>], iteration_bounds = array<i64: 1>, scalar_prefetch = 0 : i64, scratch_operands = 0 : i64, tpu.core_type = #tpu.core_type<tc>, window_params = [{transform_indices = @transform_0, window_bounds = array<i64: 64, 32>}, {pipeline_mode = #tpu.pipeline_mode<synchronous>, transform_indices = @transform_1, window_bounds = array<i64: 32, 384>}, {pipeline_mode = #tpu.pipeline_mode<synchronous>, transform_indices = @transform_2, window_bounds = array<i64: 1, 384>}, {transform_indices = @transform_3, window_bounds = array<i64: 64, 384>}]} {
    %c0 = arith.constant 0 : index
    %c0_0 = arith.constant 0 : index
    %0 = vector.load %arg1[%c0, %c0_0] : memref<64x32xf32, #tpu.memory_space<vmem>>, vector<64x32xf32>
    %c0_1 = arith.constant 0 : index
    %c0_2 = arith.constant 0 : index
    %1 = vector.load %arg2[%c0_1, %c0_2] : memref<32x384xf32, #tpu.memory_space<vmem>>, vector<32x384xf32>
    %cst = arith.constant dense<0.000000e+00> : vector<64x384xf32>
    %2 = tpu.matmul %0, %1, %cst {dimension_numbers = #tpu.dot_dimension_numbers<[1], [0], [0], [1], [0, 0, 1, 1], [], []>} : vector<64x32xf32>, vector<32x384xf32>, vector<64x384xf32> -> vector<64x384xf32>
    %c0_3 = arith.constant 0 : index
    %c0_4 = arith.constant 0 : index
    %3 = vector.load %arg3[%c0_3, %c0_4] : memref<1x384xf32, #tpu.memory_space<vmem>>, vector<1x384xf32>
    %4 = vector.broadcast %3 : vector<1x384xf32> to vector<64x384xf32>
    %5 = arith.addf %2, %4 : vector<64x384xf32>
    %c0_5 = arith.constant 0 : index
    %c0_6 = arith.constant 0 : index
    %6 = vector.load %arg4[%c0_5, %c0_6] : memref<64x384xf32, #tpu.memory_space<vmem>>, vector<64x384xf32>
    tpu.vector_store %arg4[%c0_5, %c0_6], %5 {strides = array<i32>} : memref<64x384xf32, #tpu.memory_space<vmem>>, vector<64x384xf32>,
    return
  }
  func.func @transform_0(%arg0: i32) -> (i32, i32) {
    %c0_i32 = arith.constant 0 : i32
    %c0_i32_0 = arith.constant 0 : i32
    return %arg0, %c0_i32 : i32, i32
  }
  func.func @transform_1(%arg0: i32) -> (i32, i32) {
    %c0_i32 = arith.constant 0 : i32
    %c0_i32_0 = arith.constant 0 : i32
    %c0_i32_1 = arith.constant 0 : i32
    return %c0_i32, %c0_i32_0 : i32, i32
  }
  func.func @transform_2(%arg0: i32) -> (i32, i32) {
    %c0_i32 = arith.constant 0 : i32
    %c0_i32_0 = arith.constant 0 : i32
    %c0_i32_1 = arith.constant 0 : i32
    return %c0_i32, %c0_i32_0 : i32, i32
  }
  func.func @transform_3(%arg0: i32) -> (i32, i32) {
    %c0_i32 = arith.constant 0 : i32
    %c0_i32_0 = arith.constant 0 : i32
    return %arg0, %c0_i32 : i32, i32
  }
}

</mosaic_0001>

<bundles_post_ra>
// kernel: tpu_custom_call.1
= control target key start
LH: loop header
LB: loop body
LE: loop exit
PB: predicated region body
PF: predicated region fallthrough
CT: control target
= control target key end

     0   :  { %v431_v7 = vmov 0.0   ;;  %s566_s0 = inlined_call_operand.vmem [shape: f32[64,32], index: 0, kind: input, shape index: {}]   ;;  %s567_s1 = inlined_call_operand.vmem [shape: f32[32,384], index: 1, kind: input, shape index: {}]   ;;  %s568_s2 = inlined_call_operand.vmem [shape: f32[1,384], index: 2, kind: input, shape index: {}]   ;;  %s569_s3 = inlined_call_operand.hbm [shape: f32[64,384], index: 3, kind: output, shape index: {}]  }
   0x1   :  { %v24_v0 = vld [vmem:[%s567_s1 + $0x8] sm:$0xff]  ;;  %v27_v1 = vld [vmem:[%s567_s1 + $0x20] sm:$0xff]  ;;  %v26_v4 = vld [vmem:[%s567_s1 + $0x18] sm:$0xff]  ;;  %141 = vmatprep.mubr.f32.mxu0 %v431_v7  ;;  %177 = vmatprep.mubr.f32.mxu1 %v431_v7 }
   0x2   :  { %v23_v2 = vld [vmem:[%s567_s1] sm:$0xff]  ;;  %v383_v3 = vpack.c.bf16 %v27_v1, %v24_v0  ;;  %v30_v5 = vld [vmem:[%s567_s1 + $0x38] sm:$0xff]  ;;  %v33_v6 = vld [vmem:[%s567_s1 + $0x50] sm:$0xff] }
   0x3   :  { %v385_v8 = vpack.c.bf16 %v26_v4, %v23_v2  ;;  %v387_v9 = vpack.c.bf16 %v33_v6, %v30_v5  ;;  %v29_v10 = vld [vmem:[%s567_s1 + $0x30] sm:$0xff]  ;;  %v32_v11 = vld [vmem:[%s567_s1 + $0x48] sm:$0xff]  ;;  %v31_v16 = vld [vmem:[%s567_s1 + $0x40] sm:$0xff] }
   0x4   :  { %384 = vmatprep.subr.bf16.mxu0 %v383_v3  ;;  %399 = vmatprep.subr.bf16.mxu1 %v383_v3  ;;  %v25_v12 = vld [vmem:[%s567_s1 + $0x10] sm:$0xff]  ;;  %v28_v13 = vld [vmem:[%s567_s1 + $0x28] sm:$0xff]  ;;  %v389_v14 = vpack.c.bf16 %v32_v11, %v29_v10  ;;  %v34_v17 = vld [vmem:[%s567_s1 + $0x58] sm:$0xff] }
   0x5   :  { %386 = vmatpush1.bf16.msra.mxu0 %v385_v8  ;;  %401 = vmatpush1.bf16.msra.mxu1 %v385_v8  ;;  %v391_v15 = vpack.c.bf16 %v28_v13, %v25_v12 }
   0x6   :  { %388 = vmatprep.subr.bf16.mxu0 %v387_v9  ;;  %400 = vmatprep.subr.bf16.mxu1 %v387_v9 }
   0x7   :  { %8 = vsyncpa [#allocation3], 0  ;;  %v15_v18 = vld [vmem:[%s566_s0] sm:$0xff]  ;;  %vm52_vm0 = vcmask 261120   ;;  %v21_v19 = vld [vmem:[%s566_s0 + $0x30] sm:$0xff]  ;;  %v395_v20 = vpack.c.bf16 %v34_v17, %v31_v16  ;;  %v37_v27 = vlaneseq }
   0x8   :  { %v16_v21 = vld [vmem:[%s566_s0 + $0x8] sm:$0xff]  ;;  %v22_v22 = vld [vmem:[%s566_s0 + $0x38] sm:$0xff]  ;;  %v17_v23 = vld [vmem:[%s566_s0 + $0x10] sm:$0xff] }
   0x9   :  { %390 = vmatpush1.bf16.msra.mxu0 %v389_v14  ;;  %402 = vmatpush1.bf16.msra.mxu1 %v389_v14  ;;  %v18_v24 = vld [vmem:[%s566_s0 + $0x18] sm:$0xff]  ;;  %v19_v25 = vld [vmem:[%s566_s0 + $0x20] sm:$0xff]  ;;  %v20_v26 = vld [vmem:[%s566_s0 + $0x28] sm:$0xff]  ;;  %v38_v28 = vshrl.u32 %v37_v27, 7  ;;  %s432_s0 = smov [#allocation2]  }
   0xa   :  { %392 = vmatprep.subr.bf16.mxu1 %v391_v15  ;;  %v35_v30 = vld [vmem:[%s568_s2] sm:$0x7]  ;;  %s324_s2 = sshll.u32 %s432_s0, 4  ;;  %s325_s2 = int_to_ptr.vmem [resolvable:$true] %s324_s2 }
   0xb   :  { %v39_v29 = vsub.s32 0, %v38_v28  ;;  %v43_v31 = vsub.s32 1, %v38_v28  ;;  %v47_v40 = vsub.s32 2, %v38_v28  ;;  %s407_s26 = scalar_lea.vmem %s325_s2, 3072  ;;  %p412_p1 = scmp.lt.s32.totalorder %s325_s2, %s325_s2 }
   0xc   :  { %335 = vmatmul.mubr.msk.f32.vlgmr.msra.gmra.mrb[0].mxu0 %vm52_vm0, %v15_v18  ;;  %341 = vmatmul.mubr.msk.f32.vlgmr.msra.gmra.mrb[0].mxu1 %vm52_vm0, %v21_v19  ;;  %p408_p0 = scmp.ne.s32.totalorder %s325_s2, %s407_s26  ;;  %p413_p2 = scmp.lt.s32.totalorder %s407_s26, %s407_s26 }
   0xd   :  { %394 = vmatpush3.bf16.msra.mxu1 %v391_v15  ;;  %147 = vmatprep.mubr.f32.mxu0 %v431_v7  ;;  %v534_v32 = vrot.slane %v35_v30, %v39_v29  ;;  %v536_v33 = vrot.slane %v35_v30, %v43_v31  ;;  %v48_v49 = vrot.slane %v35_v30, %v47_v40 }
   0xe   :  { %183 = vmatprep.mubr.f32.mxu1 %v431_v7  ;;  %396 = vmatprep.subr.bf16.mxu1 %v395_v20  ;;  %p414_p3 = por %p413_p2, %p412_p1 }
  0x10   :  { %336 = vmatmul.mubr.msk.f32.gmra.mrb[2].mxu0 %vm52_vm0, %v16_v21  ;;  %342 = vmatmul.mubr.msk.f32.gmra.mrb[2].mxu1 %vm52_vm0, %v22_v22  ;;  %p415_p4 = pnand %p414_p3, %p408_p0 }
  0x11   :  { %398 = vmatpush3.bf16.msra.mxu1 %v395_v20  ;;  %153 = vmatprep.mubr.f32.mxu0 %v431_v7 }
  0x12   :  { %371 = vmatprep.mubr.msk.f32.mxu1 %vm52_vm0, %v15_v18 }
  0x14   :  { %337 = vmatmul.mubr.msk.f32.gmra.mrb[4].mxu0 %vm52_vm0, %v17_v23  ;;  %372 = vmatmul.mubr.msk.f32.vlgmr.msra.gmra.mrb[4].mxu1 %vm52_vm0, %v16_v21 }
  0x15   :  { %159 = vmatprep.mubr.f32.mxu0 %v431_v7  ;;  %374 = vmatprep.mubr.msk.f32.mxu1 %vm52_vm0, %v17_v23 }
  0x18   :  { %338 = vmatmul.mubr.msk.f32.gmra.mrb[6].mxu0 %vm52_vm0, %v18_v24  ;;  %375 = vmatmul.mubr.msk.f32.gmra.mrb[6].mxu1 %vm52_vm0, %v18_v24 }
  0x19   :  { %165 = vmatprep.mubr.f32.mxu0 %v431_v7  ;;  %377 = vmatprep.mubr.msk.f32.mxu1 %vm52_vm0, %v19_v25 }
  0x1c   :  { %339 = vmatmul.mubr.msk.f32.gmra.mrb[8].mxu0 %vm52_vm0, %v19_v25  ;;  %378 = vmatmul.mubr.msk.f32.gmra.mrb[8].mxu1 %vm52_vm0, %v20_v26 }
  0x1d   :  { %171 = vmatprep.mubr.f32.mxu0 %v431_v7  ;;  %380 = vmatprep.mubr.msk.f32.mxu1 %vm52_vm0, %v21_v19 }
  0x20   :  { %340 = vmatmul.mubr.msk.f32.gmra.mrb[10].mxu0 %vm52_vm0, %v20_v26  ;;  %381 = vmatmul.mubr.msk.f32.gmra.mrb[10].mxu1 %vm52_vm0, %v22_v22 }
  0xdf   :  { %v143_v34 = vpop.f32.mrb[0].mxu0  ;;  %v179_v35 = vpop.f32.mrb[0].mxu1 }
  0xe0   :  { %v144_v36 = vadd.f32 %v143_v34, %v534_v32  ;;  %v180_v37 = vadd.f32 %v179_v35, %v534_v32  ;;  %v145_v38 = vpop.f32.mrb[1].mxu0  ;;  %v181_v39 = vpop.f32.mrb[1].mxu1 }
  0xe1   :  { %v146_v41 = vadd.f32 %v145_v38, %v536_v33  ;;  %v182_v42 = vadd.f32 %v181_v39, %v536_v33 }
  0xe2   :  { %295 = vst [vmem:[#allocation2] sm:$0xff] %v144_v36  ;;  %313 = vst [vmem:[#allocation2 + $0x90] sm:$0xff] %v180_v37 }
  0xe3   :  { %296 = vst [vmem:[#allocation2 + $0x8] sm:$0xff] %v146_v41  ;;  %314 = vst [vmem:[#allocation2 + $0x98] sm:$0xff] %v182_v42  ;;  %v149_v43 = vpop.f32.mrb[2].mxu0  ;;  %v185_v44 = vpop.f32.mrb[2].mxu1 }
  0xe4   :  { %v150_v45 = vadd.f32 %v149_v43, %v534_v32  ;;  %v186_v46 = vadd.f32 %v185_v44, %v534_v32  ;;  %v151_v47 = vpop.f32.mrb[3].mxu0  ;;  %v187_v48 = vpop.f32.mrb[3].mxu1 }
  0xe5   :  { %v152_v50 = vadd.f32 %v151_v47, %v536_v33  ;;  %v188_v51 = vadd.f32 %v187_v48, %v536_v33 }
  0xe6   :  { %298 = vst [vmem:[#allocation2 + $0x18] sm:$0xff] %v150_v45  ;;  %316 = vst [vmem:[#allocation2 + $0xa8] sm:$0xff] %v186_v46 }
  0xe7   :  { %299 = vst [vmem:[#allocation2 + $0x20] sm:$0xff] %v152_v50  ;;  %317 = vst [vmem:[#allocation2 + $0xb0] sm:$0xff] %v188_v51  ;;  %v155_v52 = vpop.f32.mrb[4].mxu0  ;;  %v373_v53 = vpop.f32.mrb[4].mxu1 }
  0xe8   :  { %v156_v54 = vadd.f32 %v155_v52, %v534_v32  ;;  %v262_v55 = vadd.f32 %v373_v53, %v48_v49  ;;  %v157_v56 = vpop.f32.mrb[5].mxu0  ;;  %v256_v57 = vpop.f32.mrb[5].mxu1 }
  0xe9   :  { %v158_v58 = vadd.f32 %v157_v56, %v536_v33  ;;  %v257_v59 = vadd.f32 %v256_v57, %v48_v49 }
  0xea   :  { %301 = vst [vmem:[#allocation2 + $0x30] sm:$0xff] %v156_v54  ;;  %300 = vst [vmem:[#allocation2 + $0x28] sm:$0xff] %v262_v55 }
  0xeb   :  { %302 = vst [vmem:[#allocation2 + $0x38] sm:$0xff] %v158_v58  ;;  %297 = vst [vmem:[#allocation2 + $0x10] sm:$0xff] %v257_v59  ;;  %v161_v60 = vpop.f32.mrb[6].mxu0  ;;  %v376_v61 = vpop.f32.mrb[6].mxu1 }
  0xec   :  { %v162_v62 = vadd.f32 %v161_v60, %v534_v32  ;;  %v272_v63 = vadd.f32 %v376_v61, %v48_v49  ;;  %v163_v0 = vpop.f32.mrb[7].mxu0  ;;  %v266_v1 = vpop.f32.mrb[7].mxu1 }
  0xed   :  { %v164_v2 = vadd.f32 %v163_v0, %v536_v33  ;;  %v267_v3 = vadd.f32 %v266_v1, %v48_v49 }
  0xee   :  { %304 = vst [vmem:[#allocation2 + $0x48] sm:$0xff] %v162_v62  ;;  %306 = vst [vmem:[#allocation2 + $0x58] sm:$0xff] %v272_v63 }
  0xef   :  { %305 = vst [vmem:[#allocation2 + $0x50] sm:$0xff] %v164_v2  ;;  %303 = vst [vmem:[#allocation2 + $0x40] sm:$0xff] %v267_v3  ;;  %v167_v4 = vpop.f32.mrb[8].mxu0  ;;  %v379_v5 = vpop.f32.mrb[8].mxu1 }
  0xf0   :  { %v168_v6 = vadd.f32 %v167_v4, %v534_v32  ;;  %v282_v7 = vadd.f32 %v379_v5, %v48_v49  ;;  %v169_v8 = vpop.f32.mrb[9].mxu0  ;;  %v276_v9 = vpop.f32.mrb[9].mxu1 }
  0xf1   :  { %v170_v10 = vadd.f32 %v169_v8, %v536_v33  ;;  %v277_v11 = vadd.f32 %v276_v9, %v48_v49 }
  0xf2   :  { %307 = vst [vmem:[#allocation2 + $0x60] sm:$0xff] %v168_v6  ;;  %312 = vst [vmem:[#allocation2 + $0x88] sm:$0xff] %v282_v7 }
  0xf3   :  { %308 = vst [vmem:[#allocation2 + $0x68] sm:$0xff] %v170_v10  ;;  %309 = vst [vmem:[#allocation2 + $0x70] sm:$0xff] %v277_v11  ;;  %v173_v12 = vpop.f32.mrb[10].mxu0  ;;  %v382_v13 = vpop.f32.mrb[10].mxu1 }
  0xf4   :  { %v174_v14 = vadd.f32 %v173_v12, %v534_v32  ;;  %v292_v15 = vadd.f32 %v382_v13, %v48_v49  ;;  %v175_v16 = vpop.f32.mrb[11].mxu0  ;;  %v286_v17 = vpop.f32.mrb[11].mxu1 }
  0xf5   :  { %v176_v18 = vadd.f32 %v175_v16, %v536_v33  ;;  %v287_v19 = vadd.f32 %v286_v17, %v48_v49 }
  0xf6   :  { %310 = vst [vmem:[#allocation2 + $0x78] sm:$0xff] %v174_v14  ;;  %318 = vst [vmem:[#allocation2 + $0xb8] sm:$0xff] %v292_v15 }
  0xf7   :  { %311 = vst [vmem:[#allocation2 + $0x80] sm:$0xff] %v176_v18  ;;  %315 = vst [vmem:[#allocation2 + $0xa0] sm:$0xff] %v287_v19 }
  0xf8   :  { %418 = shalt.err (!%p415_p4)
}
  0xf9   :  { %s419_s29 = scalar_lea.hbm %s569_s3, 3072 }
  0xfa   :  { %p420_p5 = scmp.ne.s32.totalorder %s569_s3, %s419_s29  ;;  %p423_p6 = scmp.lt.u32.totalorder %s419_s29, %s569_s3 }
  0xfc   :  { %p425_p7 = pnand %p423_p6, %p420_p5 }
  0xfe   :  { %428 = shalt.err (!%p425_p7)
}
  0xff   :  { %s433_s7 = smov 384   ;;  %s434_s8 = smov 24  }
 0x100   :  { %330 = dma.vmem_to_hbm [thread:$0]  %s325_s2, 3072, %s569_s3, [#allocation3], %s433_s7, %s433_s7, %s434_s8  }
 0x101   :  { %429 = dma.done.wait [#allocation3], 3072  }
 0x102   :  { %430 = vsyncadd [#allocation3], 4294964224 }
 0x103   :  { %334 = vsyncpa [#allocation3], 1 }

</bundles_post_ra>
